<compile_context>
chip_gen: v6e
topology: v6e:2x2x1
jax: 0.10.0
libtpu: 0.0.40
codegen_flags: <defaults>
</compile_context>

<pallas_src>
import jax
import jax.numpy as jnp
import numpy as np
from jax.experimental import pallas as pl
from jax.experimental.pallas import tpu as pltpu

_LANE = 128
_MAX_BATCH_FOLD = 16      # cap on the static unroll over folded batches


# ----------------------------- budgeting / tiling ---------------------------

def _vmem_budget():
    """(total live pipeline-buffer budget, vmem_limit_bytes), per generation."""
    try:
        cap = int(pltpu.get_tpu_info().vmem_capacity_bytes)
    except Exception:
        cap = 64 << 20                       # assume the smallest (v7x) if unknown
    if cap <= (64 << 20):                    # v7x-class: 64 MiB VMEM -> ~3 MiB tiles
        budget = 24 << 20
    else:                                    # v5e / v6e: 128 MiB VMEM -> ~6 MiB tiles
        budget = 48 << 20
    limit = min(cap - (8 << 20), budget + (16 << 20))
    return budget, max(limit, budget)


def _choose_tiles(B, rows, x_bytes, tab_bytes, n_tabs, budget):
    """Pick (row_tile, n_row_tiles, batch_fold, n_batch_tiles).

    Live pipeline VMEM ~= 2 * (KB*TR*128*x_bytes*2 + TR*128*tab_bytes*n_tabs).
    """
    per_row = 2 * _LANE * (2 * x_bytes + n_tabs * tab_bytes)      # KB == 1
    tr_cap = max(8, budget // per_row)
    if rows > tr_cap:
        # Large plane: tile rows; multiple-of-8 sublanes, ragged last tile is OK.
        tr = max(8, (tr_cap // 8) * 8)
        kb = 1
    else:
        # Small plane: whole plane in one tile; fold batches to fill sublanes
        # and amortize per-grid-step overhead.
        tr = rows
        per_batch = 2 * 2 * rows * _LANE * x_bytes
        fixed = 2 * rows * _LANE * tab_bytes * n_tabs
        kb_cap = min(int((budget - fixed) // per_batch), _MAX_BATCH_FOLD, B)
        kb = 1
        for c in range(max(kb_cap, 1), 0, -1):    # largest divisor of B within cap
            if B % c == 0:
                kb = c
                break
    nt = pl.cdiv(rows, tr)
    nb = B // kb
    # Keep >= 2 grid steps when cheap: v7x shards "parallel" axes over 2 TCs.
    if nt * nb == 1:
        if B >= 2:
            for c in range(B // 2, 0, -1):
                if B % c == 0:
                    kb = c
                    break
            nb = B // kb
        elif rows >= 16:
            tr = max(8, (((rows + 1) // 2) + 7) // 8 * 8)
            nt = pl.cdiv(rows, tr)
    return tr, nt, kb, nb


# ----------------------------- Pallas kernels -------------------------------

def _rope_kernel(x_ref, cos_ref, sin_ref, o_ref):
    """RoPE on one (KB, TR, 128) tile.  f32 math, cast on store.

    cos[r, 2i] = cos[r, 2i+1] = cos(angle)
    sin[r, 2i] = -sin(angle); sin[r, 2i+1] = +sin(angle)
    out = x * cos + swap_pairs(x) * sin
    swap_pairs = two XLU rotates + lane-parity select; the wrapped lane of
    each rotate lands only on the parity the select discards.
    """
    cos = cos_ref[0].astype(jnp.float32)                       # (TR, 128)
    sin = sin_ref[0].astype(jnp.float32)
    lane = jax.lax.broadcasted_iota(jnp.int32, cos.shape, dimension=1)
    is_even = (lane & 1) == 0
    for b in range(x_ref.shape[0]):                            # static unroll, KB <= 16
        x = x_ref[b].astype(jnp.float32)                       # (TR, 128)
        x_next = pltpu.roll(x, shift=_LANE - 1, axis=1)        # x_next[j] = x[j+1]
        x_prev = pltpu.roll(x, shift=1, axis=1)                 # x_prev[j] = x[j-1]
        swapped = jnp.where(is_even, x_next, x_prev)
        o_ref[b] = (x * cos + swapped * sin).astype(o_ref.dtype)


def _add_pe_kernel(x_ref, pe_ref, o_ref):
    """Additive sinusoidal PE on one (KB, TR, 128) tile (f32 math, cast on store)."""
    pe = pe_ref[0].astype(jnp.float32)
    for b in range(x_ref.shape[0]):
        o_ref[b] = (x_ref[b].astype(jnp.float32) + pe).astype(o_ref.dtype)


# ----------------------------- wrapper ---------------------------------------

def _elementwise_call(kernel, x, tables):
    """Run `kernel` over x:(B, S, D) with per-position tables [(S, D), ...]."""
    B, S, D = x.shape
    flat = S * D
    rows = pl.cdiv(flat, _LANE)
    padded = rows * _LANE

    budget, vmem_limit = _vmem_budget()
    tr, nt, kb, nb = _choose_tiles(B, rows, x.dtype.itemsize,
                                   tables[0].dtype.itemsize, len(tables), budget)

    xf = x.reshape(B, flat)
    if padded != flat:                       # lane-dense padding replaces masked stores
        xf = jnp.pad(xf, ((0, 0), (0, padded - flat)))
    xp = xf.reshape(B, rows, _LANE)

    tabs = []
    for t in tables:
        tf = t.reshape(flat)
        if padded != flat:
            tf = jnp.pad(tf, (0, padded - flat))
        tabs.append(tf.reshape(1, rows, _LANE))

    x_spec = pl.BlockSpec((kb, tr, _LANE), lambda t, b: (b, t, 0))
    # Table block index is constant across the inner batch loop -> stays resident.
    tab_spec = pl.BlockSpec((1, tr, _LANE), lambda t, b: (0, t, 0))

    out = pl.pallas_call(
        kernel,
        out_shape=jax.ShapeDtypeStruct((B, rows, _LANE), x.dtype),
        grid=(nt, nb),
        in_specs=[x_spec] + [tab_spec] * len(tabs),
        out_specs=pl.BlockSpec((kb, tr, _LANE), lambda t, b: (b, t, 0)),
        compiler_params=pltpu.CompilerParams(
            dimension_semantics=("parallel", "parallel"),
            vmem_limit_bytes=vmem_limit,
        ),
    )(xp, *tabs)

    out = out.reshape(B, padded)
    if padded != flat:
        out = out[:, :flat]
    return out.reshape(B, S, D)


# ----------------------------- module ----------------------------------------

def _table_dtype(x_dtype):
    # Half-precision activations -> half-precision tables (halves table HBM traffic).
    # Note: bf16 tables add ~2^-8 relative error to the rotation terms.
    return x_dtype if x_dtype.itemsize <= 2 else jnp.float32


class GlobalPositionalEncoding:
    """JAX/Pallas port of the PyTorch GlobalPositionalEncoding module."""

    def __init__(self, d_model, max_len=10000,
                 use_global_positional_encoding=True, use_rope=True):
        self.use_global_positional_encoding = use_global_positional_encoding
        self.use_rope = use_rope
        self.d_model = d_model
        self.max_len = max_len
        self._rope_cache = {}            # (seq_len, dtype) -> (cos_full, sin_signed)
        self.pe = None
        if use_global_positional_encoding and (not use_rope):
            position = jnp.arange(max_len, dtype=jnp.float32)[:, None]          # (L, 1)
            dim_idx = jnp.arange(0, d_model, 2, dtype=jnp.float32)              # (D/2,)
            div_term = jnp.exp(dim_idx * (-jnp.log(10000.0) / d_model))         # (D/2,)
            angle = position * div_term[None, :]                                # (L, D/2)
            pe = jnp.zeros((max_len, d_model), jnp.float32)
            pe = pe.at[:, 0::2].set(jnp.sin(angle))
            pe = pe.at[:, 1::2].set(jnp.cos(angle)[:, : d_model // 2])
            self.pe = pe                                                        # (L, D)

    def _rope_tables(self, seq_len, dtype):
        key = (seq_len, np.dtype(dtype).name)
        cached = self._rope_cache.get(key)
        if cached is not None:
            return cached
        position = jnp.arange(seq_len, dtype=jnp.float32)[:, None]              # (S, 1)
        dim_idx = jnp.arange(0, self.d_model, 2, dtype=jnp.float32)             # (D/2,)
        div_term = jnp.exp(-jnp.log(10000.0) * dim_idx / self.d_model)          # (D/2,)
        angle = position * div_term[None, :]                                    # (S, D/2)
        sin = jnp.sin(angle)
        cos = jnp.cos(angle)
        cos_full = jnp.repeat(cos, 2, axis=-1)                                  # (S, D)
        sin_signed = jnp.stack([-sin, sin], axis=-1).reshape(seq_len, self.d_model)
        tables = (cos_full.astype(dtype), sin_signed.astype(dtype))
        self._rope_cache[key] = tables
        return tables

    def __call__(self, x):
        if not self.use_global_positional_encoding:
            return x
        seq_len = x.shape[1]
        if self.use_rope:
            if self.d_model % 2:
                raise ValueError("RoPE requires an even d_model.")
            cos_full, sin_signed = self._rope_tables(seq_len, _table_dtype(x.dtype))
            return _elementwise_call(_rope_kernel, x, [cos_full, sin_signed])
        if seq_len > self.max_len:
            raise ValueError(f"seq_len={seq_len} exceeds max_len={self.max_len}.")
        pe_slice = self.pe[:seq_len].astype(_table_dtype(x.dtype))              # (S, D)
        return _elementwise_call(_add_pe_kernel, x, [pe_slice])


# ----------------------------- reference (pure JAX, mirrors torch) -----------

def _rope_reference(x, d_model):
    S = x.shape[1]
    position = jnp.arange(S, dtype=jnp.float32)[:, None]
    dim_idx = jnp.arange(0, d_model, 2, dtype=jnp.float32)
    div_term = jnp.exp(-jnp.log(10000.0) * dim_idx / d_model)
    angle = position * div_term[None, :]
    sin = jnp.sin(angle)[None]       # (1, S, D/2)
    cos = jnp.cos(angle)[None]
    xf = x.astype(jnp.float32)
    x1, x2 = xf[..., 0::2], xf[..., 1::2]
    even = x1 * cos - x2 * sin
    odd = x1 * sin + x2 * cos
    return jnp.stack([even, odd], axis=-1).reshape(x.shape).astype(x.dtype)


# ----------------------------- main -------------------------------------------

if __name__ == "__main__":
    key = jax.random.PRNGKey(0)
    k0, k1, k2, k3 = jax.random.split(key, 4)

    # 1) RoPE, D < 128 (flattened lane-dense layout).
    B, S, D = 2, 8, 32
    x = jax.random.normal(k0, (B, S, D), dtype=jnp.float32)
    module = GlobalPositionalEncoding(d_model=D)
    out = jax.block_until_ready(module(x))
    np.testing.assert_allclose(np.asarray(out), np.asarray(_rope_reference(x, D)),
                               rtol=1e-5, atol=1e-5)

    # 2) RoPE, D a multiple of 128 (already lane-dense).
    B2, S2, D2 = 2, 16, 128
    x2 = jax.random.normal(k1, (B2, S2, D2), dtype=jnp.float32)
    out2 = jax.block_until_ready(GlobalPositionalEncoding(d_model=D2)(x2))
    np.testing.assert_allclose(np.asarray(out2), np.asarray(_rope_reference(x2, D2)),
                               rtol=1e-5, atol=1e-5)

    # 3) RoPE, S*D not a multiple of 128 (exercises the padded lane-dense path
    #    that replaces the old masked-store fallback).
    B3, S3, D3 = 2, 7, 32
    x3 = jax.random.normal(k2, (B3, S3, D3), dtype=jnp.float32)
    out3 = jax.block_until_ready(GlobalPositionalEncoding(d_model=D3)(x3))
    np.testing.assert_allclose(np.asarray(out3), np.asarray(_rope_reference(x3, D3)),
                               rtol=1e-5, atol=1e-5)

    # 4) RoPE with bf16 activations (tables cast to bf16 to halve table traffic).
    x4 = jax.random.normal(k3, (2, 8, 32), dtype=jnp.bfloat16)
    out4 = jax.block_until_ready(GlobalPositionalEncoding(d_model=32)(x4))
    ref4 = _rope_reference(x4, 32)
    np.testing.assert_allclose(np.asarray(out4.astype(jnp.float32)),
                               np.asarray(ref4.astype(jnp.float32)),
                               rtol=5e-2, atol=5e-2)

    # 5) Additive sinusoidal positional encoding (use_rope=False).
    module_pe = GlobalPositionalEncoding(d_model=D, max_len=64, use_rope=False)
    out_pe = jax.block_until_ready(module_pe(x))
    ref_pe = x + module_pe.pe[:S][None]
    np.testing.assert_allclose(np.asarray(out_pe), np.asarray(ref_pe),
                               rtol=1e-5, atol=1e-5)

    print("KERNEL_OK")
</pallas_src>

<mosaic_0001>
module attributes {stable_mosaic.version = 11 : i64} {
  func.func @_rope_kernel(%arg0: i32, %arg1: i32, %arg2: memref<1x2x128xf32, #tpu.memory_space<vmem>>, %arg3: memref<1x2x128xf32, #tpu.memory_space<vmem>>, %arg4: memref<1x2x128xf32, #tpu.memory_space<vmem>>, %arg5: memref<1x2x128xf32, #tpu.memory_space<vmem>>) attributes {dimension_semantics = [#tpu.dimension_semantics<parallel>, #tpu.dimension_semantics<parallel>], iteration_bounds = array<i64: 1, 2>, scalar_prefetch = 0 : i64, scratch_operands = 0 : i64, tpu.core_type = #tpu.core_type<tc>, window_params = [{transform_indices = @transform_0, window_bounds = array<i64: 1, 2, 128>}, {transform_indices = @transform_1, window_bounds = array<i64: 1, 2, 128>}, {transform_indices = @transform_2, window_bounds = array<i64: 1, 2, 128>}, {transform_indices = @transform_3, window_bounds = array<i64: 1, 2, 128>}]} {
    %c0 = arith.constant 0 : index
    %c0_0 = arith.constant 0 : index
    %c0_1 = arith.constant 0 : index
    %0 = vector.load %arg3[%c0, %c0_0, %c0_1] : memref<1x2x128xf32, #tpu.memory_space<vmem>>, vector<1x2x128xf32>
    %1 = vector.shape_cast %0 : vector<1x2x128xf32> to vector<2x128xf32>
    %c0_2 = arith.constant 0 : index
    %c0_3 = arith.constant 0 : index
    %c0_4 = arith.constant 0 : index
    %2 = vector.load %arg4[%c0_2, %c0_3, %c0_4] : memref<1x2x128xf32, #tpu.memory_space<vmem>>, vector<1x2x128xf32>
    %3 = vector.shape_cast %2 : vector<1x2x128xf32> to vector<2x128xf32>
    %4 = tpu.iota {dimensions = array<i32: 1>} : vector<2x128xi32>
    %c1_i32 = arith.constant 1 : i32
    %5 = vector.broadcast %c1_i32 : i32 to vector<2x128xi32>
    %6 = arith.andi %4, %5 : vector<2x128xi32>
    %c0_i32 = arith.constant 0 : i32
    %7 = vector.broadcast %c0_i32 : i32 to vector<2x128xi32>
    %8 = arith.cmpi eq, %6, %7 : vector<2x128xi32>
    %c0_5 = arith.constant 0 : index
    %c0_6 = arith.constant 0 : index
    %c0_7 = arith.constant 0 : index
    %9 = vector.load %arg2[%c0_5, %c0_6, %c0_7] : memref<1x2x128xf32, #tpu.memory_space<vmem>>, vector<1x2x128xf32>
    %10 = vector.shape_cast %9 : vector<1x2x128xf32> to vector<2x128xf32>
    %c127_i32 = arith.constant 127 : i32
    %11 = tpu.dynamic_rotate %10 by %c127_i32 dim 1 : vector<2x128xf32>, i32 -> vector<2x128xf32>
    %c1_i32_8 = arith.constant 1 : i32
    %12 = tpu.dynamic_rotate %10 by %c1_i32_8 dim 1 : vector<2x128xf32>, i32 -> vector<2x128xf32>
    %13 = arith.select %8, %11, %12 : vector<2x128xi1>, vector<2x128xf32>
    %14 = arith.mulf %10, %1 : vector<2x128xf32>
    %15 = arith.mulf %13, %3 : vector<2x128xf32>
    %16 = arith.addf %14, %15 : vector<2x128xf32>
    %c0_9 = arith.constant 0 : index
    %c0_10 = arith.constant 0 : index
    %c0_11 = arith.constant 0 : index
    %17 = vector.load %arg5[%c0_9, %c0_10, %c0_11] : memref<1x2x128xf32, #tpu.memory_space<vmem>>, vector<1x2x128xf32>
    %18 = vector.shape_cast %17 : vector<1x2x128xf32> to vector<2x128xf32>
    %19 = vector.shape_cast %16 : vector<2x128xf32> to vector<1x2x128xf32>
    tpu.vector_store %arg5[%c0_9, %c0_10, %c0_11], %19 {strides = array<i32>} : memref<1x2x128xf32, #tpu.memory_space<vmem>>, vector<1x2x128xf32>,
    return
  }
  func.func @transform_0(%arg0: i32, %arg1: i32) -> (i32, i32, i32) {
    %c0_i32 = arith.constant 0 : i32
    %c0_i32_0 = arith.constant 0 : i32
    return %arg1, %arg0, %c0_i32 : i32, i32, i32
  }
  func.func @transform_1(%arg0: i32, %arg1: i32) -> (i32, i32, i32) {
    %c0_i32 = arith.constant 0 : i32
    %c0_i32_0 = arith.constant 0 : i32
    %c0_i32_1 = arith.constant 0 : i32
    return %c0_i32, %arg0, %c0_i32_0 : i32, i32, i32
  }
  func.func @transform_2(%arg0: i32, %arg1: i32) -> (i32, i32, i32) {
    %c0_i32 = arith.constant 0 : i32
    %c0_i32_0 = arith.constant 0 : i32
    %c0_i32_1 = arith.constant 0 : i32
    return %c0_i32, %arg0, %c0_i32_0 : i32, i32, i32
  }
  func.func @transform_3(%arg0: i32, %arg1: i32) -> (i32, i32, i32) {
    %c0_i32 = arith.constant 0 : i32
    %c0_i32_0 = arith.constant 0 : i32
    return %arg1, %arg0, %c0_i32 : i32, i32, i32
  }
}

</mosaic_0001>

<bundles_post_ra>
// kernel: tpu_custom_call.1
= control target key start
LH: loop header
LB: loop body
LE: loop exit
PB: predicated region body
PF: predicated region fallthrough
CT: control target
= control target key end

     0   :  { %8 = vsyncpa [#allocation3], 0  ;;  %s798_s0 = inlined_call_operand.hbm [shape: f32[2,2,128], index: 0, kind: input, shape index: {}]   ;;  %s799_s1 = inlined_call_operand.hbm [shape: f32[1,2,128], index: 1, kind: input, shape index: {}]   ;;  %s800_s2 = inlined_call_operand.vmem [shape: f32[1,2,128], index: 2, kind: input, shape index: {}]   ;;  %s801_s3 = inlined_call_operand.hbm [shape: f32[2,2,128], index: 3, kind: output, shape index: {}]  }
   0x1   :  { %10 = vsyncpa [#allocation3 + $0x1], 0 }
   0x2   :  { %11 = vsyncpa [#allocation6], 0 }
   0x3   :  { %12 = vsyncpa [#allocation4], 0 }
   0x4   :  { %14 = vsyncpa [#allocation4 + $0x1], 0  ;;  %s634_s12 = smov 0   ;;  %s636_s13 = smov 0  }
   0x5   :  { %s638_s14 = smov 0   ;;  %s640_s15 = smov 0  }
   0x6   :  { %s642_s16 = smov 0   ;;  %s644_s17 = smov 0  }
   0x7 LB: > { %s378_s18 = sadd.s32 4294967295, %s607_s17   ;;  %s379_s19 = sadd.s32 4294967294, %s607_s17   ;;  %s607_s17 = sphi %s644_s17, %s20_s17   ;;  %s603_s16 = sphi %s642_s16, %s818_s16   ;;  %s599_s15 = sphi %s640_s15, %s817_s15   ;;  %s595_s14 = sphi %s638_s14, %s816_s14   ;;  %s591_s13 = sphi %s636_s13, %s815_s13   ;;  %s587_s12 = sphi %s634_s12, %s814_s12  }
   0x8   : > { %p54_p0 = scmp.ne.s32.totalorder %s591_s13, %s587_s12  ;;  %p668_p1 = scmp.eq.s32.totalorder %s378_s18, 0 }
   0x9   : > { %p672_p2 = scmp.eq.s32.totalorder %s378_s18, 1  ;;  %p138_p3 = scmp.eq.s32.totalorder %s379_s19, 1 }
   0xa   : > { %p678_p4 = por %p668_p1, %p54_p0  ;;  %p380_p5 = scmp.ge.s32.totalorder %s607_s17, 1 }
   0xb   : > { %p683_p6 = por %p138_p3, %p54_p0  ;;  %p145_p7 = scmp.lt.s32.totalorder %s607_s17, 3 }
   0xc   : > { %s805_s22 = scalar_select %p678_p4, 1, 0 }
   0xd   : > { %s806_s23 = scalar_select %p683_p6, 1, 0 }
   0xe   : > { %p688_p8 = pnand %p380_p5, %p145_p7  ;;  %s609_s25 = smov [#allocation5]  }
   0xf   : > { %s160_s26 = sshll.u32 %s609_s25, 4  ;;  %s29_s28 = sadd.s32 1, %s603_s16  ;;  %s161_s26 = int_to_ptr.vmem [resolvable:$true] %s160_s26 }
  0x10   : > { %p402_p10 = pneg %p688_p8  ;;  %s41_s29 = sadd.s32 1, %s595_s14 }
  0x11   : > { %p30_p12 = scmp.ge.s32.totalorder %s29_s28, 2  ;;  %s480_s30 = scalar_lea.vmem %s161_s26, 32 }
  0x12   : > { %p697_p11 = pnand %p402_p10, %p668_p1  ;;  %p481_p0 = scmp.ne.s32.totalorder %s161_s26, %s480_s30 }
  0x13   : > { %p488_p7 = scmp.lt.s32.totalorder %s161_s26, %s161_s26  ;;  %p489_p6 = scmp.lt.s32.totalorder %s480_s30, %s480_s30 }
  0x14   : > { %p471_p13 = pneg %p697_p11 }
  0x15   : > { %p490_p9 = por %p489_p6, %p488_p7 }
  0x16   : > { %p483_p3 = pnand %p481_p0, %p471_p13 }
  0x18   : > { %p484_p5 = pneg %p483_p3 }
  0x1a   : > { %p491_p4 = pnand %p490_p9, %p484_p5 }
  0x1c   : > { %494 = shalt.err (!%p491_p4)
}
  0x1d   : > { %405 = dma.hbm_to_vmem [thread:$0]  (!%p697_p11), %s799_s1, 32, %s161_s26, [#allocation6]  }
  0x1e   : > { %s820_s28 = smov (%p30_p12, %s29_s28), 0  ;;  %p48_p6 = scmp.ne.s32.totalorder %s595_s14, %s591_s13 }
  0x1f   : > { %p49_p4 = scmp.eq.s32.totalorder %s607_s17, 0  ;;  %s36_s6 = ssub.s32 %s603_s16, %s820_s28 }
  0x20   : > { %p415_p9 = scmp.lt.s32.totalorder %s607_s17, 2  ;;  %p39_p10 = scmp.eq.s32.totalorder %s36_s6, 0 }
  0x21   : > { %p50_p13 = por %p49_p4, %p48_p6  ;;  %p720_p0 = por %p672_p2, %p48_p6 }
  0x22   : > { %s178_s8 = sand.u32 1, %s595_s14   ;;  %s385_s11 = sshll.u32 %s603_s16, 5 }
  0x23   : > { %s726_s9 = scalar_select %p39_p10, %s595_s14, %s41_s29  }
  0x24   : > { %s384_s10 = sshll.u32 %s178_s8, 1  ;;  %s188_s25 = scalar_lea.hbm %s798_s0, %s385_s11 }
  0x25   : > { %s182_s26 = scalar_lea.vmem [#allocation2], %s384_s10  ;;  %p732_p11 = pnand %p415_p9, %p50_p13 }
  0x26   : > { %s190_s27 = sshll.u32 %s182_s26, 4  ;;  %s179_s21 = scalar_lea.sflag [#allocation3], %s178_s8  ;;  %s191_s27 = int_to_ptr.vmem [resolvable:$true] %s190_s27 }
  0x27   : > { %p497_p2 = pneg %p732_p11  ;;  %s508_s4 = scalar_lea.vmem %s191_s27, 32 }
  0x28   : > { %p509_p12 = scmp.ne.s32.totalorder %s191_s27, %s508_s4  ;;  %s610_s29 = smov [#allocation2]  }
  0x29   : > { %s513_s5 = sshll.u32 %s610_s29, 4  ;;  %s514_s5 = int_to_ptr.vmem [resolvable:$false] %s513_s5 }
  0x2a   : > { %p511_p3 = pnand %p509_p12, %p497_p2  ;;  %s515_s6 = scalar_lea.vmem %s514_s5, 64 }
  0x2b   : > { %p516_p7 = scmp.lt.s32.totalorder %s191_s27, %s514_s5  ;;  %p517_p6 = scmp.lt.s32.totalorder %s515_s6, %s508_s4 }
  0x2c   : > { %p512_p5 = pneg %p511_p3 }
  0x2d   : > { %p518_p4 = por %p517_p6, %p516_p7 }
  0x2f   : > { %p519_p10 = pnand %p518_p4, %p512_p5 }
  0x31   : > { %522 = shalt.err (!%p519_p10)
}
  0x32   : > { %409 = dma.hbm_to_vmem [thread:$0]  (!%p732_p11), %s188_s25, 32, %s191_s27, %s179_s21  }
  0x33   : > { %199 = sbr.rel (%p688_p8) target bundleno = 197 (0xc5), region = 32  ;;  %s743_s8 = sand.u32 (!%p688_p8), 1, %s591_s13  }
  0x34   : > { %s387_s10 = sshll.u32 (!%p688_p8), %s743_s8, 1  ;;  %s202_s11 = scalar_lea.sflag (!%p688_p8), [#allocation3], %s743_s8 }
  0x35   : > { %s205_s18 = scalar_lea.vmem (!%p688_p8), [#allocation2], %s387_s10  ;;  %p811_p9 = scmp.ne.s32.totalorder (!%p688_p8), %s805_s22, 0 }
  0x38   : > { %574 = dma.done.wait (%p811_p9), %s202_s11, 32  }
  0x39   : > { %576 = vsyncadd (%p811_p9), %s202_s11, 4294967264 }
  0x3a   : > { %578 = dma.done.wait (%p668_p1), [#allocation6], 32  }
  0x3b   : > { %580 = vsyncadd (%p668_p1), [#allocation6], 4294967264  ;;  %v246_v0 = vld [vmem:[%s205_s18] sm:$0x3]  ;;  %s611_s24 = smov 127   ;;  %s612_s19 = smov 1   ;;  %v242_v1 = vlaneseq }
  0x3c   : > { %247 = vrot.lane.b32.xlu0 %v246_v0, %s611_s24  ;;  %v240_v5 = vld [vmem:[#allocation5] sm:$0x3]  ;;  %v241_v6 = vld [vmem:[%s800_s2] sm:$0x3]  ;;  %s391_s20 = sshll.u32 %s599_s15, 5  ;;  %s235_s26 = scalar_lea.vmem [#allocation7], %s387_s10 }
  0x3d   : > { %v243_v2 = vand.u32 127, %v242_v1  ;;  %v252_v7 = vmul.f32 %v246_v0, %v240_v5  ;;  %s271_s27 = sshll.u32 %s235_s26, 4  ;;  %s269_s4 = scalar_lea.hbm %s801_s3, %s391_s20  ;;  %s272_s27 = int_to_ptr.vmem [resolvable:$true] %s271_s27 }
  0x3e   : > { %s257_s29 = scalar_lea.sflag [#allocation4], %s743_s8  ;;  %s523_s5 = scalar_lea.vmem %s272_s27, 32 }
  0x3f   : > { %v244_v3 = vand.u32 1, %v243_v2  ;;  %p524_p1 = scmp.ne.s32.totalorder %s272_s27, %s523_s5  ;;  %s613_s6 = smov [#allocation7]  }
  0x40   : > { %249 = vrot.lane.b32.xlu0 %v246_v0, %s612_s19  ;;  %s527_s11 = sshll.u32 %s613_s6, 4  ;;  %s528_s11 = int_to_ptr.vmem [resolvable:$false] %s527_s11 }
  0x41   : > { %vm245_vm0 = vcmp.eq.s32.totalorder %v244_v3, 0  ;;  %p525_p8 = pnand %p524_p1, %p720_p0  ;;  %s529_s15 = scalar_lea.vmem %s528_s11, 64 }
  0x42   : > { %p530_p11 = scmp.lt.s32.totalorder %s272_s27, %s528_s11  ;;  %p531_p2 = scmp.lt.s32.totalorder %s529_s15, %s523_s5 }
  0x43   : > { %p526_p13 = pneg %p525_p8 }
  0x44   : > { %p532_p12 = por %p531_p2, %p530_p11 }
  0x46   : > { %p533_p3 = pnand %p532_p12, %p526_p13 }
  0xae   : > { %v248_v4 = vpop.permute.xlu0 %247 }
  0xb2   : > { %v250_v8 = vpop.permute.xlu0 %249 }
  0xb3   : > { %v251_v9 = vsel %vm245_vm0, %v248_v4, %v250_v8 }
  0xb4   : > { %v253_v10 = vmul.f32 %v251_v9, %v241_v6 }
  0xb6   : > { %v254_v11 = vadd.f32 %v253_v10, %v252_v7 }
  0xb8   : > { %255 = vst [vmem:[%s235_s26] sm:$0x3] %v254_v11 }
  0xb9   : > { %536 = shalt.err (!%p533_p3)
}
  0xba   : > { %s537_s10 = scalar_lea.hbm %s269_s4, 32  ;;  %s541_s24 = scalar_lea.hbm %s801_s3, 64 }
  0xbb   : > { %p538_p5 = scmp.ne.s32.totalorder %s269_s4, %s537_s10  ;;  %p542_p4 = scmp.lt.s32.totalorder %s269_s4, %s801_s3 }
  0xbc   : > { %p543_p10 = scmp.lt.s32.totalorder %s541_s24, %s537_s10 }
  0xbd   : > { %p539_p7 = pnand %p538_p5, %p720_p0 }
  0xbe   : > { %p544_p9 = por %p543_p10, %p542_p4 }
  0xbf   : > { %p540_p6 = pneg %p539_p7 }
  0xc1   : > { %p545_p1 = pnand %p544_p9, %p540_p6 }
  0xc3   : > { %548 = shalt.err (!%p545_p1)
}
  0xc4   : > { %400 = dma.vmem_to_hbm [thread:$0]  (%p720_p0), %s272_s27, 32, %s269_s4, %s257_s29  }
  0xc5 PF: > { %s283_s25 = sand.u32 1, %s587_s12   ;;  %p812_p8 = scmp.ne.s32.totalorder %s806_s23, 0 }
  0xc6   : > { %p813_p13 = scmp.ge.s32.totalorder %s607_s17, 2  ;;  %s284_s20 = scalar_lea.sflag [#allocation4], %s283_s25 }
  0xc8   : > { %p411_p11 = pnand %p813_p13, %p812_p8 }
  0xca   : > { %p412_p2 = pneg %p411_p11 }
  0xcc   : > { %582 = dma.done.wait (%p412_p2), %s284_s20, 32  }
  0xcd   : > { %584 = vsyncadd (%p412_p2), %s284_s20, 4294967264  ;;  %s20_s17 = sadd.s32 1, %s607_s17   ;;  %s814_s12 = smov %s591_s13 }
  0xce   : > { %p17_p12 = scmp.ge.s32.totalorder %s20_s17, 4   ;;  %s815_s13 = smov %s595_s14 }
  0xcf   : > { %s816_s14 = smov %s726_s9  ;;  %s817_s15 = smov %s603_s16 }
  0xd0   : > { %s818_s16 = smov %s820_s28  ;;  %19 = sbr.rel (!%p17_p12) target bundleno = 7 (0x7), region = 85 }
  0xd5   :  { %289 = vsyncpa [#allocation3], 1 }
  0xd6   :  { %291 = vsyncpa [#allocation3 + $0x1], 1 }
  0xd7   :  { %292 = vsyncpa [#allocation6], 1 }
  0xd8   :  { %293 = vsyncpa [#allocation4], 1 }
  0xd9   :  { %295 = vsyncpa [#allocation4 + $0x1], 1 }

</bundles_post_ra>
